<compile_context>
chip_gen: v6e
topology: v6e:2x2x1
jax: 0.10.0
libtpu: 0.0.40
codegen_flags: <defaults>
</compile_context>

<pallas_src>
import jax
import jax.numpy as jnp
from jax.experimental import pallas as pl
from jax.experimental.pallas import tpu as pltpu

# --------------- GradientHead "constructor" constants (deterministic) ---------------
MOLECULE_ENERGY_PER_ATOM_STD = 1.5
PERIODIC_ENERGY_PER_ATOM_STD = 2.0
MOLECULE_ENERGY_STD = 1.2
PERIODIC_ENERGY_STD = 0.9
MOLECULE_FORCE_STD = 0.5
PERIODIC_FORCE_STD = 0.8
PERIODIC_STRESS_MEAN = 0.1
PERIODIC_STRESS_STD = 2.0
SUPERVISE_TOTAL_ENERGY = False

# Exact branch selection as in the PyTorch forward.
_PER_E_SCALE = PERIODIC_ENERGY_STD if SUPERVISE_TOTAL_ENERGY else PERIODIC_ENERGY_PER_ATOM_STD
_MOL_E_SCALE = MOLECULE_FORCE_STD if SUPERVISE_TOTAL_ENERGY else MOLECULE_ENERGY_PER_ATOM_STD
_MEAN_OVER_STD = PERIODIC_STRESS_MEAN / PERIODIC_STRESS_STD
_EV_A3_TO_GPA = 160.21766208


# ------------------------- per-chip VMEM / block-size budgets -------------------------
def _tpu_budgets():
    """Return (vmem_limit_bytes, per-operand block byte target) for this chip."""
    try:
        vmem_cap = int(getattr(pltpu.get_tpu_info(), "vmem_capacity_bytes",
                               128 * 1024 * 1024))
    except Exception:
        vmem_cap = 128 * 1024 * 1024
    # ~30% of physical VMEM, clamped to [16, 32] MiB: ~20 MiB on v7x (64 MiB VMEM),
    # 32 MiB on v5e/v6e (128 MiB) — leaves headroom for co-resident XLA fusions.
    vmem_limit = max(16 << 20, min(32 << 20, int(vmem_cap * 0.3)))
    # Per-operand block target: v7x (small VMEM, 3.2 TB/s HBM) wants fewer/larger steps
    # (~4 MiB, so the ~0.35us per-step overhead stays <10%); v6e/v5e ~2 MiB
    # (512-1024 f32 rows measured at 85-86% of HBM roofline on v6e).
    block_bytes = (4 << 20) if vmem_cap <= (64 << 20) else (2 << 20)
    return vmem_limit, block_bytes


def _pick_lane_tile(b, lanes, block_bytes):
    """Largest multiple-of-128 divisor of `lanes` with b*tile*4B <= block_bytes."""
    if lanes % 128 != 0:
        return None  # ragged tail -> whole-array fallback (avoids vst.msk tail blocks)
    max_lanes = max(128, (block_bytes // (4 * b)) // 128 * 128)
    best = None
    t = 128
    while t <= min(lanes, max_lanes):
        if lanes % t == 0:
            best = t
        t += 128
    return best


# ---------------------------------- Pallas kernels -----------------------------------
def _forces_tile_kernel(fg_ref, nif_ref, forces_ref):
    # Hot per-tile body: one fused multiply-store (pure HBM streaming);
    # -1/force_std precomputed per system -> no per-element where/divide.
    forces_ref[...] = fg_ref[...] * nif_ref[...]


def _post_fused_kernel(fg_ref, sg_ref, sc_ref, forces_ref, stress_ref):
    # Single-launch fallback (small / lane-ragged shapes): force rescale + stress
    # normalize fused.  fg (B, N*3); sg (B, 9);
    # sc (B, 2): [:, 0:1] = -1/force_std, [:, 1:2] = 160.21766208/(vol*stress_std).
    forces_ref[...] = fg_ref[...] * sc_ref[:, 0:1]
    col = jax.lax.broadcasted_iota(jnp.int32, stress_ref.shape, 1)
    diag = (col % 4) == 0  # 3x3 diagonal of the exactly-9-wide flattened row
    stress_ref[...] = sg_ref[...] * sc_ref[:, 1:2] - jnp.where(diag, _MEAN_OVER_STD, 0.0)


# ------------------------------ Pallas call wrappers ---------------------------------
def _forces_pallas(fg2d, neg_inv_force, lane_tile, vmem_limit):
    """forces = force_grad * (-1/std), lane-tiled, written in place over force_grad."""
    B, L = fg2d.shape
    grid = (L // lane_tile,)
    return pl.pallas_call(
        _forces_tile_kernel,
        grid=grid,
        in_specs=[pl.BlockSpec((B, lane_tile), lambda i: (0, i)),
                  pl.BlockSpec((B, 1), lambda i: (0, 0))],
        out_specs=pl.BlockSpec((B, lane_tile), lambda i: (0, i)),
        out_shape=jax.ShapeDtypeStruct((B, L), jnp.float32),
        input_output_aliases={0: 0},  # overwrite the throwaway VJP buffer
        compiler_params=pltpu.CompilerParams(
            dimension_semantics=("parallel",),  # shards across v7x's 2 TensorCores
            vmem_limit_bytes=vmem_limit),
    )(fg2d, neg_inv_force)


def _post_fused_pallas(fg2d, sg2d, scales, vmem_limit):
    """One fused launch for small/ragged shapes: forces rescale + stress normalize."""
    B, L = fg2d.shape
    forces, stress = pl.pallas_call(
        _post_fused_kernel,
        grid=(1,),
        in_specs=[pl.BlockSpec((B, L), lambda i: (0, 0)),
                  pl.BlockSpec((B, 9), lambda i: (0, 0)),
                  pl.BlockSpec((B, 2), lambda i: (0, 0))],
        out_specs=(pl.BlockSpec((B, L), lambda i: (0, 0)),
                   pl.BlockSpec((B, 9), lambda i: (0, 0))),
        out_shape=(jax.ShapeDtypeStruct((B, L), jnp.float32),
                   jax.ShapeDtypeStruct((B, 9), jnp.float32)),
        input_output_aliases={0: 0, 1: 1},
        compiler_params=pltpu.CompilerParams(
            dimension_semantics=("arbitrary",),
            vmem_limit_bytes=vmem_limit),
    )(fg2d, sg2d, scales)
    return forces, stress


# ------------------- synthetic backbone (stand-in for the PSM model) -----------------
def synthetic_energy_model(pos, cell, params):
    # Plain-JAX glue: maps (strained) pos/cell -> per-atom energy (B, N) so the
    # autograd in GradientHead has a graph to differentiate through.
    W1, b1, W2 = params
    h = jnp.tanh(pos @ W1 + b1)                          # (B, N, H)
    epa = jnp.squeeze(h @ W2, axis=-1)                   # (B, N)
    epa = epa + 0.01 * jnp.sum(cell * cell, axis=(-2, -1))[:, None]
    return epa


# ------------------------------ GradientHead.forward ---------------------------------
def gradient_head_forward(pos, cell, non_atom_mask, is_periodic, is_molecule, params,
                          supervise_autograd_stress=True, post_block_bytes=None):
    B, N, _ = pos.shape
    vmem_limit, auto_block_bytes = _tpu_budgets()
    block_bytes = auto_block_bytes if post_block_bytes is None else post_block_bytes

    isp = is_periodic[:, None]                            # (B, 1) bool
    ism = is_molecule[:, None]                            # (B, 1) bool

    # Per-system scalar factors (multiplicative composition == the reference's
    # sequential wheres, since each row applies at most one of the two scales).
    e_scale = (jnp.where(isp, _PER_E_SCALE, 1.0) *
               jnp.where(ism, _MOL_E_SCALE, 1.0)).astype(jnp.float32)        # (B, 1)
    force_denom = (jnp.where(isp, PERIODIC_FORCE_STD, 1.0) *
                   jnp.where(ism, MOLECULE_FORCE_STD, 1.0))
    neg_inv_force = (-1.0 / force_denom).astype(jnp.float32)                 # (B, 1)

    def total_energy(pos_in, strain):
        # wrap_input semantics: pos' = pos @ (I + strain), cell' = cell @ (I + strain)
        eye = jnp.eye(3, dtype=pos_in.dtype)
        m = eye[None, :, :] + strain                      # (B, 3, 3)
        pos_s = jnp.einsum('bki,bij->bkj', pos_in, m)
        cell_s = jnp.matmul(cell, m)
        epa = synthetic_energy_model(pos_s, cell_s, params)                  # (B, N)
        # masked_fill + per-system scale + sum — intentionally plain jnp: energy is only
        # consumed as sum(energy) (grad_outputs = ones), so XLA fuses this reduce and
        # its VJP into the backbone epilogue (no launch, no (B,N) epa HBM round-trip).
        coef = jnp.where(non_atom_mask, 0.0, e_scale)
        return jnp.sum(epa * coef)

    strain = jnp.zeros((B, 3, 3), dtype=pos.dtype)
    L = N * 3
    lane_tile = _pick_lane_tile(B, L, block_bytes)
    use_tiled = lane_tile is not None and (L // lane_tile) >= 2

    if supervise_autograd_stress:
        force_grad, stress_grad = jax.grad(total_energy, argnums=(0, 1))(pos, strain)
        vol = jnp.abs(jnp.linalg.det(cell))                                  # (B,) glue
        s_scale = (_EV_A3_TO_GPA / (vol[:, None] * PERIODIC_STRESS_STD)).astype(jnp.float32)
        fg2d = force_grad.reshape(B, L)                   # lane-dense: xyz on lane axis
        if use_tiled:
            forces2d = _forces_pallas(fg2d, neg_inv_force, lane_tile, vmem_limit)
            # (B,3,3) stress normalize is 9 floats/system: plain jnp so the Pallas grid
            # axis can stay "parallel" (a revisited constant-index stress output block
            # would force "arbitrary" and serialize v7x's two TensorCores).
            stress = (stress_grad * s_scale[:, :, None]
                      - _MEAN_OVER_STD * jnp.eye(3, dtype=jnp.float32)[None])
        else:
            scales = jnp.concatenate([neg_inv_force, s_scale], axis=1)       # (B, 2)
            forces2d, stress2d = _post_fused_pallas(
                fg2d, stress_grad.reshape(B, 9), scales, vmem_limit)
            stress = stress2d.reshape(B, 3, 3)
        forces = forces2d.reshape(B, N, 3)
    else:
        force_grad = jax.grad(total_energy, argnums=0)(pos, strain)
        fg2d = force_grad.reshape(B, L)
        tile = lane_tile if use_tiled else L              # whole-array block if ragged
        forces2d = _forces_pallas(fg2d, neg_inv_force, tile, vmem_limit)
        forces = forces2d.reshape(B, N, 3)
        stress = None

    return forces, stress


# ------------------------- pure-JAX reference (correctness) --------------------------
def _reference_forward(pos, cell, non_atom_mask, is_periodic, is_molecule, params):
    isp = is_periodic[:, None]
    ism = is_molecule[:, None]

    def total_energy(pos_in, strain):
        eye = jnp.eye(3, dtype=pos_in.dtype)
        m = eye[None, :, :] + strain
        pos_s = jnp.einsum('bki,bij->bkj', pos_in, m)
        cell_s = jnp.matmul(cell, m)
        epa = synthetic_energy_model(pos_s, cell_s, params)
        epa = jnp.where(non_atom_mask, 0.0, epa)
        epa = jnp.where(isp, epa * _PER_E_SCALE, epa)
        epa = jnp.where(ism, epa * _MOL_E_SCALE, epa)
        return jnp.sum(epa)

    strain = jnp.zeros((pos.shape[0], 3, 3), dtype=pos.dtype)
    fg, sg = jax.grad(total_energy, argnums=(0, 1))(pos, strain)
    forces = -fg
    forces = jnp.where(isp[:, :, None], forces / PERIODIC_FORCE_STD, forces)
    forces = jnp.where(ism[:, :, None], forces / MOLECULE_FORCE_STD, forces)
    vol = jnp.abs(jnp.linalg.det(cell))
    stress = (sg * _EV_A3_TO_GPA / vol[:, None, None]
              - PERIODIC_STRESS_MEAN * jnp.eye(3, dtype=jnp.float32)[None]) / PERIODIC_STRESS_STD
    return forces, stress


# ----------------------------------------- main --------------------------------------
if __name__ == "__main__":
    key = jax.random.PRNGKey(0)
    k1, _, k3, k4 = jax.random.split(key, 4)
    H = 32

    def make_inputs(B, N, n_pad):
        kp, kc = jax.random.split(jax.random.fold_in(k1, N), 2)
        pos = jax.random.normal(kp, (B, N, 3), dtype=jnp.float32)
        cell = (5.0 * jnp.eye(3, dtype=jnp.float32)[None, :, :]
                + 0.1 * jax.random.normal(kc, (B, 3, 3), dtype=jnp.float32))
        mask = jnp.zeros((B, N), dtype=bool).at[:, N - n_pad:].set(True)
        return pos, cell, mask

    W1 = 0.3 * jax.random.normal(k3, (3, H), dtype=jnp.float32)
    b1 = jnp.zeros((H,), dtype=jnp.float32)
    W2 = 0.3 * jax.random.normal(k4, (H, 1), dtype=jnp.float32)
    params = (W1, b1, W2)

    is_periodic = jnp.array([True, False])
    is_molecule = jnp.array([False, True])

    fwd = jax.jit(gradient_head_forward,
                  static_argnames=("supervise_autograd_stress", "post_block_bytes"))

    # Case 1: small ragged shape (N*3 = 24) -> single fused whole-array launch.
    pos1, cell1, mask1 = make_inputs(2, 8, 2)
    forces1, stress1 = fwd(pos1, cell1, mask1, is_periodic, is_molecule, params,
                           supervise_autograd_stress=True)
    jax.block_until_ready((forces1, stress1))
    rf1, rs1 = _reference_forward(pos1, cell1, mask1, is_periodic, is_molecule, params)
    assert forces1.shape == (2, 8, 3) and stress1.shape == (2, 3, 3)
    assert jnp.allclose(forces1, rf1, rtol=1e-4, atol=1e-5)
    assert jnp.allclose(stress1, rs1, rtol=1e-4, atol=1e-5)

    # Case 2: lane-aligned shape (N*3 = 384) with a small block budget so the tiled,
    # "parallel", aliased forces path (grid=(3,), 128-lane blocks) is exercised.
    pos2, cell2, mask2 = make_inputs(2, 128, 4)
    forces2, stress2 = fwd(pos2, cell2, mask2, is_periodic, is_molecule, params,
                           supervise_autograd_stress=True, post_block_bytes=1024)
    jax.block_until_ready((forces2, stress2))
    rf2, rs2 = _reference_forward(pos2, cell2, mask2, is_periodic, is_molecule, params)
    assert forces2.shape == (2, 128, 3) and stress2.shape == (2, 3, 3)
    assert jnp.allclose(forces2, rf2, rtol=1e-4, atol=1e-5)
    assert jnp.allclose(stress2, rs2, rtol=1e-4, atol=1e-5)

    # Case 3: forces-only branch (supervise_autograd_stress=False).
    forces3, stress3 = fwd(pos1, cell1, mask1, is_periodic, is_molecule, params,
                           supervise_autograd_stress=False)
    jax.block_until_ready(forces3)
    assert stress3 is None
    assert jnp.allclose(forces3, rf1, rtol=1e-4, atol=1e-5)

    print("KERNEL_OK")
</pallas_src>

<mosaic_0001>
module attributes {stable_mosaic.version = 11 : i64} {
  func.func @_post_fused_kernel(%arg0: i32, %arg1: memref<2x24xf32, #tpu.memory_space<vmem>>, %arg2: memref<2x9xf32, #tpu.memory_space<vmem>>, %arg3: memref<2x2xf32, #tpu.memory_space<vmem>>, %arg4: memref<2x24xf32, #tpu.memory_space<vmem>>, %arg5: memref<2x9xf32, #tpu.memory_space<vmem>>) attributes {dimension_semantics = [#tpu.dimension_semantics<arbitrary>], iteration_bounds = array<i64: 1>, scalar_prefetch = 0 : i64, scratch_operands = 0 : i64, tpu.core_type = #tpu.core_type<tc>, window_params = [{pipeline_mode = #tpu.pipeline_mode<synchronous>, transform_indices = @transform_0, window_bounds = array<i64: 2, 24>}, {pipeline_mode = #tpu.pipeline_mode<synchronous>, transform_indices = @transform_1, window_bounds = array<i64: 2, 9>}, {pipeline_mode = #tpu.pipeline_mode<synchronous>, transform_indices = @transform_2, window_bounds = array<i64: 2, 2>}, {pipeline_mode = #tpu.pipeline_mode<synchronous>, transform_indices = @transform_3, window_bounds = array<i64: 2, 24>}, {pipeline_mode = #tpu.pipeline_mode<synchronous>, transform_indices = @transform_4, window_bounds = array<i64: 2, 9>}]} {
    %c0 = arith.constant 0 : index
    %c0_0 = arith.constant 0 : index
    %0 = vector.load %arg1[%c0, %c0_0] : memref<2x24xf32, #tpu.memory_space<vmem>>, vector<2x24xf32>
    %c0_1 = arith.constant 0 : index
    %c0_2 = arith.constant 0 : index
    %1 = vector.load %arg3[%c0_1, %c0_2] : memref<2x2xf32, #tpu.memory_space<vmem>>, vector<2x1xf32>
    %2 = vector.broadcast %1 : vector<2x1xf32> to vector<2x24xf32>
    %3 = arith.mulf %0, %2 : vector<2x24xf32>
    %c0_3 = arith.constant 0 : index
    %c0_4 = arith.constant 0 : index
    %4 = vector.load %arg4[%c0_3, %c0_4] : memref<2x24xf32, #tpu.memory_space<vmem>>, vector<2x24xf32>
    tpu.vector_store %arg4[%c0_3, %c0_4], %3 {strides = array<i32>} : memref<2x24xf32, #tpu.memory_space<vmem>>, vector<2x24xf32>,
    %5 = tpu.iota {dimensions = array<i32: 1>} : vector<2x9xi32>
    %c4_i32 = arith.constant 4 : i32
    %c0_i32 = arith.constant 0 : i32
    %6 = arith.cmpi eq, %c4_i32, %c0_i32 : i32
    %c1_i32 = arith.constant 1 : i32
    %7 = arith.select %6, %c1_i32, %c4_i32 : i32
    %8 = vector.broadcast %7 : i32 to vector<2x9xi32>
    %9 = arith.remsi %5, %8 : vector<2x9xi32>
    %c0_i32_5 = arith.constant 0 : i32
    %10 = vector.broadcast %c0_i32_5 : i32 to vector<2x9xi32>
    %11 = arith.cmpi ne, %9, %10 : vector<2x9xi32>
    %c0_i32_6 = arith.constant 0 : i32
    %12 = vector.broadcast %c0_i32_6 : i32 to vector<2x9xi32>
    %13 = arith.cmpi slt, %9, %12 : vector<2x9xi32>
    %c0_i32_7 = arith.constant 0 : i32
    %14 = arith.cmpi slt, %7, %c0_i32_7 : i32
    %15 = vector.broadcast %14 : i1 to vector<2x9xi1>
    %16 = vector.broadcast %15 : vector<2x9xi1> to vector<2x9xi1>
    %17 = arith.xori %13, %16 : vector<2x9xi1>
    %18 = arith.andi %17, %11 : vector<2x9xi1>
    %19 = vector.broadcast %7 : i32 to vector<2x9xi32>
    %20 = arith.addi %9, %19 : vector<2x9xi32>
    %21 = arith.select %18, %20, %9 : vector<2x9xi1>, vector<2x9xi32>
    %c0_i32_8 = arith.constant 0 : i32
    %22 = vector.broadcast %c0_i32_8 : i32 to vector<2x9xi32>
    %23 = arith.cmpi eq, %21, %22 : vector<2x9xi32>
    %c0_9 = arith.constant 0 : index
    %c0_10 = arith.constant 0 : index
    %24 = vector.load %arg2[%c0_9, %c0_10] : memref<2x9xf32, #tpu.memory_space<vmem>>, vector<2x9xf32>
    %c0_11 = arith.constant 0 : index
    %c1 = arith.constant 1 : index
    %25 = vector.load %arg3[%c0_11, %c1] : memref<2x2xf32, #tpu.memory_space<vmem>>, vector<2x1xf32>
    %26 = vector.broadcast %25 : vector<2x1xf32> to vector<2x9xf32>
    %27 = arith.mulf %24, %26 : vector<2x9xf32>
    %cst = arith.constant 5.000000e-02 : f32
    %cst_12 = arith.constant 0.000000e+00 : f32
    %28 = vector.broadcast %cst : f32 to vector<2x9xf32>
    %29 = vector.broadcast %cst_12 : f32 to vector<2x9xf32>
    %30 = arith.select %23, %28, %29 : vector<2x9xi1>, vector<2x9xf32>
    %31 = arith.subf %27, %30 : vector<2x9xf32>
    %c0_13 = arith.constant 0 : index
    %c0_14 = arith.constant 0 : index
    %32 = vector.load %arg5[%c0_13, %c0_14] : memref<2x9xf32, #tpu.memory_space<vmem>>, vector<2x9xf32>
    tpu.vector_store %arg5[%c0_13, %c0_14], %31 {strides = array<i32>} : memref<2x9xf32, #tpu.memory_space<vmem>>, vector<2x9xf32>,
    return
  }
  func.func @transform_0(%arg0: i32) -> (i32, i32) {
    %c0_i32 = arith.constant 0 : i32
    %c0_i32_0 = arith.constant 0 : i32
    %c0_i32_1 = arith.constant 0 : i32
    return %c0_i32, %c0_i32_0 : i32, i32
  }
  func.func @transform_1(%arg0: i32) -> (i32, i32) {
    %c0_i32 = arith.constant 0 : i32
    %c0_i32_0 = arith.constant 0 : i32
    %c0_i32_1 = arith.constant 0 : i32
    return %c0_i32, %c0_i32_0 : i32, i32
  }
  func.func @transform_2(%arg0: i32) -> (i32, i32) {
    %c0_i32 = arith.constant 0 : i32
    %c0_i32_0 = arith.constant 0 : i32
    %c0_i32_1 = arith.constant 0 : i32
    return %c0_i32, %c0_i32_0 : i32, i32
  }
  func.func @transform_3(%arg0: i32) -> (i32, i32) {
    %c0_i32 = arith.constant 0 : i32
    %c0_i32_0 = arith.constant 0 : i32
    %c0_i32_1 = arith.constant 0 : i32
    return %c0_i32, %c0_i32_0 : i32, i32
  }
  func.func @transform_4(%arg0: i32) -> (i32, i32) {
    %c0_i32 = arith.constant 0 : i32
    %c0_i32_0 = arith.constant 0 : i32
    %c0_i32_1 = arith.constant 0 : i32
    return %c0_i32, %c0_i32_0 : i32, i32
  }
}

</mosaic_0001>

<bundles_post_ra>
// kernel: gradient_head_forward.1
= control target key start
LH: loop header
LB: loop body
LE: loop exit
PB: predicated region body
PF: predicated region fallthrough
CT: control target
= control target key end

     0   :  { %v67_v0 = vmov 1   ;;  %v68_v3 = vmov 0   ;;  %v26_v4 = vlaneseq  ;;  %v69_v8 = vmov 0.0   ;;  %s113_s2 = inlined_call_operand.vmem [shape: f32[2,2], index: 2, kind: input, shape index: {}]   ;;  %s114_s1 = inlined_call_operand.vmem [shape: f32[2,9], index: 1, kind: input, shape index: {}, may-alias: {1,4}]   ;;  %s115_s0 = inlined_call_operand.vmem [shape: f32[2,24], index: 0, kind: input, shape index: {}, may-alias: {0,3}]   ;;  %s116_s4 = inlined_call_operand.vmem [shape: f32[2,9], index: 4, kind: output, shape index: {1}, may-alias: {1,4}]   ;;  %s117_s3 = inlined_call_operand.vmem [shape: f32[2,24], index: 3, kind: output, shape index: {0}, may-alias: {0,3}]  }
   0x1   :  { %64 = vset.pattern.permute.xlu0 %v67_v0  ;;  %v42_v1 = vld [vmem:[%s113_s2] sm:$0x3]  ;;  %vm51_vm1 = vcmask 66560   ;;  %vm24_vm2 = vcmask 189440  }
   0x2   :  { %45 = vperm.xlu0 %64, %v42_v1   ;;  %v17_v2 = vld [vmem:[%s113_s2] sm:$0x3]  ;;  %v27_v5 = vand.u32 127, %v26_v4 }
   0x3   :  { %v41_v7 = vld [vmem:[%s114_s1] sm:$0x3] }
   0x4   :  { %v32_v6 = vand.u32 3, %v27_v5  ;;  %v16_v13 = vld [vmem:[%s115_s0] sm:$0x3] }
   0x6   :  { %65 = vset.pattern.permute.xlu0 %v68_v3  ;;  %vm40_vm0 = vcmp.eq.s32.totalorder %v32_v6, 0 }
   0x7   :  { %20 = vperm.xlu0 %65, %v17_v2   ;;  %v49_v9 = vsel %vm40_vm0, 0.05, %v69_v8 }
   0xb   :  { %66 = vset.pattern.permute.xlu0 %v67_v0 }
  0x7d   :  { %v46_v10 = vpop.permute.xlu0 %45 }
  0x7e   :  { %v48_v11 = vmul.f32 %v46_v10, %v41_v7 }
  0x80   :  { %v50_v12 = vsub.f32 %v48_v11, %v49_v9 }
  0x82   :  { %52 = vst.msk [vmem:[%s116_s4] sm:$0x3] %vm51_vm1, %v50_v12  ;;  %v21_v14 = vpop.permute.xlu0 %20 }
  0x83   :  { %v23_v15 = vmul.f32 %v21_v14, %v16_v13 }
  0x85   :  { %25 = vst.msk [vmem:[%s117_s3] sm:$0x3] %vm24_vm2, %v23_v15 }

</bundles_post_ra>
